<compile_context>
chip_gen: v7x
topology: tpu7x:2x2x1
jax: 0.10.0
libtpu: 0.0.40
codegen_flags: <defaults>
</compile_context>

<pallas_src>
import functools

import jax
import jax.numpy as jnp
from jax.experimental import pallas as pl
from jax.experimental.pallas import tpu as pltpu


def channel_attention_kernel(x_ref, w1t_ref, w2t_ref, o_ref,
                             sum_acc, max_acc, *, hw_total, hw_tile):
    hw_idx = pl.program_id(1)

    @pl.when(hw_idx == 0)
    def _init():
        sum_acc[...] = jnp.zeros_like(sum_acc)
        max_acc[...] = jnp.full_like(max_acc, -jnp.inf)

    x = x_ref[...]                                   # (B_TILE, C, HW_TILE), input dtype

    if hw_total % hw_tile != 0:
        # Mask the padded tail of the last spatial tile (0 for sum, -inf for max).
        lane = jax.lax.broadcasted_iota(jnp.int32, x.shape, 2)
        valid = (hw_idx * hw_tile + lane) < hw_total
        x_sum = jnp.where(valid, x, jnp.zeros((), x.dtype))
        x_max = jnp.where(valid, x, jnp.full((), -jnp.inf, x.dtype))
    else:
        x_sum = x
        x_max = x

    # Accumulate in f32 without materializing an f32 copy of the whole block.
    sum_acc[...] += jnp.sum(x_sum, axis=-1, dtype=jnp.float32)
    max_acc[...] = jnp.maximum(max_acc[...],
                               jnp.max(x_max, axis=-1).astype(jnp.float32))

    @pl.when(hw_idx == pl.num_programs(1) - 1)
    def _finalize():
        b_tile = sum_acc.shape[0]
        avg = sum_acc[...] * (1.0 / hw_total)        # (B_TILE, C)  == AdaptiveAvgPool2d(1)
        mx = max_acc[...]                            # (B_TILE, C)  == AdaptiveMaxPool2d(1)
        pooled = jnp.concatenate([avg, mx], axis=0)  # (2*B_TILE, C)

        w1t = w1t_ref[...].astype(jnp.float32)       # (C, hidden)   fc1 weight^T
        w2t = w2t_ref[...].astype(jnp.float32)       # (hidden, C)   fc2 weight^T

        # Shared MLP, fused over the stacked avg/max rows (one matmul per layer).
        h = jnp.maximum(
            jnp.dot(pooled, w1t, preferred_element_type=jnp.float32), 0.0)
        y = jnp.dot(h, w2t, preferred_element_type=jnp.float32)

        gate = jax.nn.sigmoid(y[:b_tile] + y[b_tile:])
        o_ref[...] = gate.astype(o_ref.dtype)


def channel_attention(x, w1, w2, *, b_tile=8, target_block_bytes=2 * 1024 * 1024):
    """x: (B, C, H, W) NCHW. w1: (C//16, C) fc1 1x1-conv weight (squeezed).
    w2: (C, C//16) fc2 1x1-conv weight (squeezed). Returns (B, C, 1, 1)."""
    B, C, H, W = x.shape
    hidden = w1.shape[0]
    HW = H * W
    itemsize = x.dtype.itemsize

    x_flat = x.reshape(B, C, HW)
    w1t = jnp.transpose(w1)      # (C, hidden)
    w2t = jnp.transpose(w2)      # (hidden, C)

    # Batch tile: several samples per grid step so each DMA is a sizable slab.
    B_TILE = B if B <= b_tile else b_tile

    # Spatial tile: ~target_block_bytes per x block, lane-aligned (multiple of
    # 128) unless the full spatial extent fits. Keeps (block * 2 buffers) well
    # under the scoped-VMEM default on all of v5e/v6e/v7x.
    target_hw = max(128, target_block_bytes // max(1, B_TILE * C * itemsize))
    if HW <= target_hw:
        HW_TILE = HW
    else:
        HW_TILE = max(128, (target_hw // 128) * 128)

    grid = (pl.cdiv(B, B_TILE), pl.cdiv(HW, HW_TILE))

    cost = pl.CostEstimate(
        flops=2 * (2 * B) * C * hidden * 2,          # two tiny fused matmuls
        transcendentals=B * C,                       # sigmoid
        bytes_accessed=(B * C * HW * itemsize
                        + 2 * C * hidden * w1.dtype.itemsize
                        + B * C * itemsize),
    )

    kernel = functools.partial(channel_attention_kernel,
                               hw_total=HW, hw_tile=HW_TILE)

    out = pl.pallas_call(
        kernel,
        out_shape=jax.ShapeDtypeStruct((B, C), x.dtype),
        grid_spec=pltpu.PrefetchScalarGridSpec(
            num_scalar_prefetch=0,
            grid=grid,
            in_specs=[
                pl.BlockSpec((B_TILE, C, HW_TILE), lambda b, h: (b, 0, h)),
                pl.BlockSpec((C, hidden), lambda b, h: (0, 0)),
                pl.BlockSpec((hidden, C), lambda b, h: (0, 0)),
            ],
            out_specs=pl.BlockSpec((B_TILE, C), lambda b, h: (b, 0)),
            scratch_shapes=[
                pltpu.VMEM((B_TILE, C), jnp.float32),   # running sum
                pltpu.VMEM((B_TILE, C), jnp.float32),   # running max
            ],
        ),
        compiler_params=pltpu.CompilerParams(
            dimension_semantics=("parallel", "arbitrary")),
        cost_estimate=cost,
    )(x_flat, w1t, w2t)

    return out.reshape(B, C, 1, 1)


def channel_attention_ref(x, w1, w2):
    # pure-JAX reference matching the PyTorch forward
    avg = jnp.mean(x, axis=(2, 3))                   # (B, C)
    mx = jnp.max(x, axis=(2, 3))                     # (B, C)

    def mlp(p):
        h = jnp.maximum(p @ w1.T, 0.0)
        return h @ w2.T

    out = mlp(avg) + mlp(mx)
    return jax.nn.sigmoid(out)[:, :, None, None]


if __name__ == "__main__":
    key = jax.random.PRNGKey(0)
    B, C = 2, 64                        # in_planes=64 -> hidden = 64 // 16 = 4
    hidden = C // 16

    kx, k1, k2, kx2 = jax.random.split(key, 4)
    # deterministic "conv" weights (1x1 convs, bias=False) — squeezed to 2D
    w1 = 0.1 * jax.random.normal(k1, (hidden, C), dtype=jnp.float32)   # fc1.weight[:, :, 0, 0]
    w2 = 0.1 * jax.random.normal(k2, (C, hidden), dtype=jnp.float32)   # fc2.weight[:, :, 0, 0]

    # Case 1: single spatial step (HW fits in one tile).
    x1 = jax.random.normal(kx, (B, C, 16, 16), dtype=jnp.float32)
    out1 = jax.block_until_ready(channel_attention(x1, w1, w2))
    ref1 = channel_attention_ref(x1, w1, w2)
    assert out1.shape == (B, C, 1, 1)
    assert jnp.allclose(out1, ref1, atol=1e-5, rtol=1e-5)

    # Case 2: force spatial tiling with a remainder tile (exercises the
    # arbitrary-axis reduction + masking path).
    x2 = jax.random.normal(kx2, (B, C, 18, 18), dtype=jnp.float32)     # HW = 324
    out2 = jax.block_until_ready(
        channel_attention(x2, w1, w2, target_block_bytes=64 * 1024))
    ref2 = channel_attention_ref(x2, w1, w2)
    assert out2.shape == (B, C, 1, 1)
    assert jnp.allclose(out2, ref2, atol=1e-5, rtol=1e-5)

    print("KERNEL_OK")
</pallas_src>

<mosaic_0001>
module attributes {stable_mosaic.version = 11 : i64} {
  func.func @channel_attention_kernel(%arg0: i32, %arg1: i32, %arg2: memref<2x64x256xf32, #tpu.memory_space<vmem>>, %arg3: memref<64x4xf32, #tpu.memory_space<vmem>>, %arg4: memref<4x64xf32, #tpu.memory_space<vmem>>, %arg5: memref<2x64xf32, #tpu.memory_space<vmem>>, %arg6: memref<2x64xf32, #tpu.memory_space<vmem>>, %arg7: memref<2x64xf32, #tpu.memory_space<vmem>>) attributes {dimension_semantics = [#tpu.dimension_semantics<parallel>, #tpu.dimension_semantics<arbitrary>], iteration_bounds = array<i64: 1, 1>, scalar_prefetch = 0 : i64, scratch_operands = 2 : i64, tpu.core_type = #tpu.core_type<tc>, window_params = [{transform_indices = @transform_0, window_bounds = array<i64: 2, 64, 256>}, {pipeline_mode = #tpu.pipeline_mode<synchronous>, transform_indices = @transform_1, window_bounds = array<i64: 64, 4>}, {pipeline_mode = #tpu.pipeline_mode<synchronous>, transform_indices = @transform_2, window_bounds = array<i64: 4, 64>}, {transform_indices = @transform_3, window_bounds = array<i64: 2, 64>}]} {
    %c0_i32 = arith.constant 0 : i32
    %0 = arith.cmpi eq, %arg1, %c0_i32 : i32
    %1 = arith.extui %0 : i1 to i32
    %c0_i32_0 = arith.constant 0 : i32
    %2 = arith.cmpi ne, %1, %c0_i32_0 : i32
    scf.if %2 {
      %cst_14 = arith.constant 0.000000e+00 : f32
      %15 = vector.broadcast %cst_14 : f32 to vector<2x64xf32>
      %c0_15 = arith.constant 0 : index
      %c0_16 = arith.constant 0 : index
      %16 = vector.load %arg6[%c0_15, %c0_16] : memref<2x64xf32, #tpu.memory_space<vmem>>, vector<2x64xf32>
      tpu.vector_store %arg6[%c0_15, %c0_16], %15 {strides = array<i32>} : memref<2x64xf32, #tpu.memory_space<vmem>>, vector<2x64xf32>,
      %cst_17 = arith.constant 0xFF800000 : f32
      %17 = vector.broadcast %cst_17 : f32 to vector<2x64xf32>
      %c0_18 = arith.constant 0 : index
      %c0_19 = arith.constant 0 : index
      %18 = vector.load %arg7[%c0_18, %c0_19] : memref<2x64xf32, #tpu.memory_space<vmem>>, vector<2x64xf32>
      tpu.vector_store %arg7[%c0_18, %c0_19], %17 {strides = array<i32>} : memref<2x64xf32, #tpu.memory_space<vmem>>, vector<2x64xf32>,
    } else {
    }
    %c0 = arith.constant 0 : index
    %c0_1 = arith.constant 0 : index
    %c0_2 = arith.constant 0 : index
    %3 = vector.load %arg2[%c0, %c0_1, %c0_2] : memref<2x64x256xf32, #tpu.memory_space<vmem>>, vector<2x64x256xf32>
    %c0_3 = arith.constant 0 : index
    %c0_4 = arith.constant 0 : index
    %4 = vector.load %arg6[%c0_3, %c0_4] : memref<2x64xf32, #tpu.memory_space<vmem>>, vector<2x64xf32>
    %cst = arith.constant dense<0.000000e+00> : vector<2x64xf32>
    %5 = vector.multi_reduction <add>, %3, %cst [2] : vector<2x64x256xf32> to vector<2x64xf32>
    %6 = arith.addf %4, %5 : vector<2x64xf32>
    %c0_5 = arith.constant 0 : index
    %c0_6 = arith.constant 0 : index
    %7 = vector.load %arg6[%c0_5, %c0_6] : memref<2x64xf32, #tpu.memory_space<vmem>>, vector<2x64xf32>
    tpu.vector_store %arg6[%c0_5, %c0_6], %6 {strides = array<i32>} : memref<2x64xf32, #tpu.memory_space<vmem>>, vector<2x64xf32>,
    %c0_7 = arith.constant 0 : index
    %c0_8 = arith.constant 0 : index
    %8 = vector.load %arg7[%c0_7, %c0_8] : memref<2x64xf32, #tpu.memory_space<vmem>>, vector<2x64xf32>
    %cst_9 = arith.constant dense<0xFF800000> : vector<2x64xf32>
    %9 = vector.multi_reduction <maximumf>, %3, %cst_9 [2] : vector<2x64x256xf32> to vector<2x64xf32>
    %10 = arith.maximumf %8, %9 : vector<2x64xf32>
    %c0_10 = arith.constant 0 : index
    %c0_11 = arith.constant 0 : index
    %11 = vector.load %arg7[%c0_10, %c0_11] : memref<2x64xf32, #tpu.memory_space<vmem>>, vector<2x64xf32>
    tpu.vector_store %arg7[%c0_10, %c0_11], %10 {strides = array<i32>} : memref<2x64xf32, #tpu.memory_space<vmem>>, vector<2x64xf32>,
    %c0_i32_12 = arith.constant 0 : i32
    %12 = arith.cmpi eq, %arg1, %c0_i32_12 : i32
    %13 = arith.extui %12 : i1 to i32
    %c0_i32_13 = arith.constant 0 : i32
    %14 = arith.cmpi ne, %13, %c0_i32_13 : i32
    scf.if %14 {
      %c0_14 = arith.constant 0 : index
      %c0_15 = arith.constant 0 : index
      %15 = vector.load %arg6[%c0_14, %c0_15] : memref<2x64xf32, #tpu.memory_space<vmem>>, vector<2x64xf32>
      %cst_16 = arith.constant 3.906250e-03 : f32
      %16 = vector.broadcast %cst_16 : f32 to vector<2x64xf32>
      %17 = arith.mulf %15, %16 : vector<2x64xf32>
      %c0_17 = arith.constant 0 : index
      %c0_18 = arith.constant 0 : index
      %18 = vector.load %arg7[%c0_17, %c0_18] : memref<2x64xf32, #tpu.memory_space<vmem>>, vector<2x64xf32>
      %19 = tpu.concatenate %17, %18 in 0 : vector<2x64xf32>, vector<2x64xf32> -> vector<4x64xf32>
      %c0_19 = arith.constant 0 : index
      %c0_20 = arith.constant 0 : index
      %20 = vector.load %arg3[%c0_19, %c0_20] : memref<64x4xf32, #tpu.memory_space<vmem>>, vector<64x4xf32>
      %c0_21 = arith.constant 0 : index
      %c0_22 = arith.constant 0 : index
      %21 = vector.load %arg4[%c0_21, %c0_22] : memref<4x64xf32, #tpu.memory_space<vmem>>, vector<4x64xf32>
      %cst_23 = arith.constant dense<0.000000e+00> : vector<4x4xf32>
      %22 = tpu.matmul %19, %20, %cst_23 {dimension_numbers = #tpu.dot_dimension_numbers<[1], [0], [0], [1], [0, 0, 1, 1], [], []>} : vector<4x64xf32>, vector<64x4xf32>, vector<4x4xf32> -> vector<4x4xf32>
      %cst_24 = arith.constant 0.000000e+00 : f32
      %23 = vector.broadcast %cst_24 : f32 to vector<4x4xf32>
      %24 = arith.maximumf %22, %23 : vector<4x4xf32>
      %cst_25 = arith.constant dense<0.000000e+00> : vector<4x64xf32>
      %25 = tpu.matmul %24, %21, %cst_25 {dimension_numbers = #tpu.dot_dimension_numbers<[1], [0], [0], [1], [0, 0, 1, 1], [], []>} : vector<4x4xf32>, vector<4x64xf32>, vector<4x64xf32> -> vector<4x64xf32>
      %26 = vector.extract_strided_slice %25 {offsets = [0, 0], sizes = [2, 64], strides = [1, 1]} : vector<4x64xf32> to vector<2x64xf32>
      %27 = vector.extract_strided_slice %25 {offsets = [2, 0], sizes = [2, 64], strides = [1, 1]} : vector<4x64xf32> to vector<2x64xf32>
      %28 = arith.addf %26, %27 : vector<2x64xf32>
      %29 = arith.negf %28 : vector<2x64xf32>
      %30 = math.exp %29 : vector<2x64xf32>
      %cst_26 = arith.constant 1.000000e+00 : f32
      %31 = vector.broadcast %cst_26 : f32 to vector<2x64xf32>
      %32 = arith.addf %31, %30 : vector<2x64xf32>
      %33 = arith.divf %31, %32 : vector<2x64xf32>
      %c0_27 = arith.constant 0 : index
      %c0_28 = arith.constant 0 : index
      %34 = vector.load %arg5[%c0_27, %c0_28] : memref<2x64xf32, #tpu.memory_space<vmem>>, vector<2x64xf32>
      tpu.vector_store %arg5[%c0_27, %c0_28], %33 {strides = array<i32>} : memref<2x64xf32, #tpu.memory_space<vmem>>, vector<2x64xf32>,
    } else {
    }
    return
  }
  func.func @transform_0(%arg0: i32, %arg1: i32) -> (i32, i32, i32) {
    %c0_i32 = arith.constant 0 : i32
    %c0_i32_0 = arith.constant 0 : i32
    return %arg0, %c0_i32, %arg1 : i32, i32, i32
  }
  func.func @transform_1(%arg0: i32, %arg1: i32) -> (i32, i32) {
    %c0_i32 = arith.constant 0 : i32
    %c0_i32_0 = arith.constant 0 : i32
    %c0_i32_1 = arith.constant 0 : i32
    return %c0_i32, %c0_i32_0 : i32, i32
  }
  func.func @transform_2(%arg0: i32, %arg1: i32) -> (i32, i32) {
    %c0_i32 = arith.constant 0 : i32
    %c0_i32_0 = arith.constant 0 : i32
    %c0_i32_1 = arith.constant 0 : i32
    return %c0_i32, %c0_i32_0 : i32, i32
  }
  func.func @transform_3(%arg0: i32, %arg1: i32) -> (i32, i32) {
    %c0_i32 = arith.constant 0 : i32
    %c0_i32_0 = arith.constant 0 : i32
    return %arg0, %c0_i32 : i32, i32
  }
}

</mosaic_0001>

<bundles_post_ra>
// kernel: tpu_custom_call.1
= control target key start
LH: loop header
LB: loop body
LE: loop exit
PB: predicated region body
PF: predicated region fallthrough
CT: control target
= control target key end

     0   :  { %8 = vsyncpa [#allocation5], 0  ;;  %s906_s0 = inlined_call_operand.hbm [shape: f32[2,64,256], index: 0, kind: input, shape index: {}]   ;;  %s907_s1 = inlined_call_operand.vmem [shape: f32[64,4], index: 1, kind: input, shape index: {}]   ;;  %s908_s2 = inlined_call_operand.vmem [shape: f32[4,64], index: 2, kind: input, shape index: {}]   ;;  %s909_s3 = inlined_call_operand.hbm [shape: f32[2,64], index: 3, kind: output, shape index: {}]  }
   0x1   :  { %9 = vsyncpa [#allocation6], 0  ;;  %s690_s12 = smov [#allocation4]   ;;  %s642_s16 = scalar_lea.hbm %s906_s0, 4096 }
   0x2   :  { %s15_s13 = sshll.u32 %s690_s12, 4  ;;  %p643_p0 = scmp.ne.s32.totalorder %s906_s0, %s642_s16  ;;  %s16_s13 = int_to_ptr.vmem [resolvable:$true] %s15_s13 }
   0x3   :  { %p646_p1 = scmp.lt.u32.totalorder %s642_s16, %s906_s0 }
   0x5   :  { %p648_p2 = pnand %p646_p1, %p643_p0 }
   0x7   :  { %651 = shalt.err (!%p648_p2)
}
   0x8   :  { %s652_s21 = scalar_lea.vmem %s16_s13, 4096  ;;  %p657_p4 = scmp.lt.s32.totalorder %s16_s13, %s16_s13 }
   0x9   :  { %p653_p3 = scmp.ne.s32.totalorder %s16_s13, %s652_s21  ;;  %p658_p5 = scmp.lt.s32.totalorder %s652_s21, %s652_s21 }
   0xb   :  { %p659_p6 = por %p658_p5, %p657_p4 }
   0xd   :  { %p660_p7 = pnand %p659_p6, %p653_p3 }
   0xf   :  { %663 = shalt.err (!%p660_p7)
}
  0x10   :  { %s691_s22 = smov 256   ;;  %s692_s23 = smov 16  }
  0x11   :  { %21 = dma.hbm_to_vmem [thread:$0]  %s906_s0, 4096, %s16_s13, [#allocation5], %s691_s22, %s691_s22, %s692_s23  }
  0x12   :  { %686 = dma.done.wait [#allocation5], 4096  }
  0x13   :  { %687 = vsyncadd [#allocation5], 4294963200  ;;  %v52_v0 = vld [vmem:[#allocation4 + $0x80] sm:$0xff]  ;;  %v53_v1 = vld [vmem:[#allocation4 + $0x88] sm:$0xff]  ;;  %vm33_vm0 = vcmask 517120   ;;  %vm696_vm1 = vmmov 0  }
  0x14   :  { %v36_v2 = vld [vmem:[#allocation4] sm:$0xff]  ;;  %v93_v3 = vadd.f32 %v53_v1, %v52_v0  ;;  %v37_v4 = vld [vmem:[#allocation4 + $0x8] sm:$0xff]  ;;  %v54_v5 = vld [vmem:[#allocation4 + $0x90] sm:$0xff]  ;;  %v258_v15 = vmax.f32 %v52_v0, %v53_v1  ;;  %v693_v0 = vmov 0.0   ;;  %v694_v1 = vmov -inf   ;;  %s697_s15 = smov [#allocation7]  }
  0x15   :  { %v55_v6 = vld [vmem:[#allocation4 + $0x98] sm:$0xff]  ;;  %v69_v7 = vadd.f32 %v37_v4, %v36_v2  ;;  %v38_v8 = vld [vmem:[#allocation4 + $0x10] sm:$0xff]  ;;  %v234_v13 = vmax.f32 %v36_v2, %v37_v4  ;;  %v56_v16 = vld [vmem:[#allocation4 + $0xa0] sm:$0xff]  ;;  %34 = vst.msk [vmem:[#allocation2] sm:$0x3] %vm33_vm0, %v693_v0  ;;  %613 = vmatprep.subr.mxu1 %v693_v0  ;;  %610 = vmatprep.mubr.msk.f32.mxu0 %vm696_vm1, %v693_v0  ;;  %vm144_vm2 = vcmask 130112  }
  0x16   :  { %v39_v9 = vld [vmem:[#allocation4 + $0x18] sm:$0xff]  ;;  %94 = vadd.xlane.f32.xlu1 %v93_v3  ;;  %v96_v10 = vadd.f32 %v55_v6, %v54_v5  ;;  %v261_v14 = vmax.f32 %v54_v5, %v55_v6  ;;  %v57_v17 = vld [vmem:[#allocation4 + $0xa8] sm:$0xff]  ;;  %v40_v18 = vld [vmem:[#allocation4 + $0x20] sm:$0xff]  ;;  %35 = vst.msk [vmem:[#allocation3] sm:$0x3] %vm33_vm0, %v694_v1  ;;  %v695_v5 = vmov 0.0|0.0   ;;  %615 = vmatprep.mubr.msk.f32.mxu1 %vm696_vm1, %v693_v0 }
  0x17   :  { %70 = vadd.xlane.f32.xlu0 %v69_v7  ;;  %v72_v11 = vadd.f32 %v39_v9, %v38_v8  ;;  %v237_v12 = vmax.f32 %v38_v8, %v39_v9  ;;  %v41_v19 = vld [vmem:[#allocation4 + $0x28] sm:$0xff]  ;;  %v99_v20 = vadd.f32 %v57_v17, %v56_v16  ;;  %v264_v22 = vmax.f32 %v56_v16, %v57_v17  ;;  %v58_v24 = vld [vmem:[#allocation4 + $0xb0] sm:$0xff]  ;;  %v59_v25 = vld [vmem:[#allocation4 + $0xb8] sm:$0xff]  ;;  %s570_s16 = sshll.u32 %s697_s15, 4  ;;  %s571_s16 = int_to_ptr.vmem [resolvable:$true] %s570_s16 }
  0x18   :  { %v75_v21 = vadd.f32 %v41_v19, %v40_v18  ;;  %v240_v23 = vmax.f32 %v40_v18, %v41_v19  ;;  %v42_v26 = vld [vmem:[#allocation4 + $0x30] sm:$0xff]  ;;  %v43_v27 = vld [vmem:[#allocation4 + $0x38] sm:$0xff]  ;;  %v102_v28 = vadd.f32 %v59_v25, %v58_v24  ;;  %v267_v30 = vmax.f32 %v58_v24, %v59_v25  ;;  %v60_v32 = vld [vmem:[#allocation4 + $0xc0] sm:$0xff]  ;;  %618 = vmatprep.subr.bf16.mxu0 %v695_v5  ;;  %p669_p9 = scmp.lt.s32.totalorder %s571_s16, %s571_s16 }
  0x19   :  { %v78_v29 = vadd.f32 %v43_v27, %v42_v26  ;;  %v243_v31 = vmax.f32 %v42_v26, %v43_v27  ;;  %v61_v33 = vld [vmem:[#allocation4 + $0xc8] sm:$0xff]  ;;  %v44_v34 = vld [vmem:[#allocation4 + $0x40] sm:$0xff]  ;;  %v62_v40 = vld [vmem:[#allocation4 + $0xd0] sm:$0xff]  ;;  %vm151_vm3 = vcmask 195712   ;;  %vm158_vm4 = vcmask 261312  }
  0x1a   :  { %97 = vadd.xlane.f32.xlu1 %v96_v10  ;;  %v45_v35 = vld [vmem:[#allocation4 + $0x48] sm:$0xff]  ;;  %v105_v36 = vadd.f32 %v61_v33, %v60_v32  ;;  %v270_v38 = vmax.f32 %v60_v32, %v61_v33  ;;  %v63_v41 = vld [vmem:[#allocation4 + $0xd8] sm:$0xff]  ;;  %v46_v42 = vld [vmem:[#allocation4 + $0x50] sm:$0xff]  ;;  %v133_v32 = vlaneseq  ;;  %vm165_vm5 = vcmask 326912  }
  0x1b   :  { %73 = vadd.xlane.f32.xlu0 %v72_v11  ;;  %v81_v37 = vadd.f32 %v45_v35, %v44_v34  ;;  %v246_v39 = vmax.f32 %v44_v34, %v45_v35  ;;  %v47_v43 = vld [vmem:[#allocation4 + $0x58] sm:$0xff]  ;;  %v108_v44 = vadd.f32 %v63_v41, %v62_v40  ;;  %v273_v46 = vmax.f32 %v62_v40, %v63_v41  ;;  %v64_v48 = vld [vmem:[#allocation4 + $0xe0] sm:$0xff]  ;;  %v65_v49 = vld [vmem:[#allocation4 + $0xe8] sm:$0xff] }
  0x1c   :  { %v84_v45 = vadd.f32 %v47_v43, %v46_v42  ;;  %v249_v47 = vmax.f32 %v46_v42, %v47_v43  ;;  %v48_v50 = vld [vmem:[#allocation4 + $0x60] sm:$0xff]  ;;  %v49_v51 = vld [vmem:[#allocation4 + $0x68] sm:$0xff]  ;;  %v111_v52 = vadd.f32 %v65_v49, %v64_v48  ;;  %v276_v54 = vmax.f32 %v64_v48, %v65_v49  ;;  %v66_v56 = vld [vmem:[#allocation4 + $0xf0] sm:$0xff] }
  0x1d   :  { %v87_v53 = vadd.f32 %v49_v51, %v48_v50  ;;  %v252_v55 = vmax.f32 %v48_v50, %v49_v51  ;;  %v67_v57 = vld [vmem:[#allocation4 + $0xf8] sm:$0xff]  ;;  %v50_v58 = vld [vmem:[#allocation4 + $0x70] sm:$0xff]  ;;  %v392_v3 = vld [vmem:[%s907_s1 + $0x8] sm:$0xff]  ;;  %v134_v35 = vand.u32 127, %v133_v32  ;;  %vm172_vm6 = vcmask 392512  }
  0x1e   :  { %238 = vmax.xlane.f32.xlu1 %v237_v12  ;;  %v51_v59 = vld [vmem:[#allocation4 + $0x78] sm:$0xff]  ;;  %v114_v60 = vadd.f32 %v67_v57, %v66_v56  ;;  %v279_v62 = vmax.f32 %v66_v56, %v67_v57  ;;  %v393_v6 = vld [vmem:[%s907_s1 + $0x10] sm:$0xff]  ;;  %v396_v10 = vld [vmem:[%s907_s1 + $0x28] sm:$0xff]  ;;  %vm179_vm7 = vcmask 458112   ;;  %vm186_vm8 = vcmask 523712  }
  0x1f   :  { %235 = vmax.xlane.f32.xlu0 %v234_v13  ;;  %v90_v61 = vadd.f32 %v51_v59, %v50_v58  ;;  %v255_v63 = vmax.f32 %v50_v58, %v51_v59  ;;  %v391_v2 = vld [vmem:[%s907_s1] sm:$0xff]  ;;  %v394_v7 = vld [vmem:[%s907_s1 + $0x18] sm:$0xff]  ;;  %v397_v12 = vld [vmem:[%s907_s1 + $0x30] sm:$0xff]  ;;  %v153_v41 = vadd.s32 4294967272, %v134_v35  ;;  %v160_v42 = vadd.s32 4294967264, %v134_v35 }
  0x20   :  { %v619_v4 = vpack.c.bf16 %v392_v3, %v391_v2  ;;  %v622_v8 = vpack.c.bf16 %v394_v7, %v393_v6  ;;  %v395_v9 = vld [vmem:[%s907_s1 + $0x20] sm:$0xff]  ;;  %v398_v13 = vld [vmem:[%s907_s1 + $0x38] sm:$0xff]  ;;  %vm227_vm9 = vcmask 1041409   ;;  %vm389_vm10 = vcmask 1041408  }
  0x21   :  { %v625_v11 = vpack.c.bf16 %v396_v10, %v395_v9  ;;  %vm400_vm11 = vcmask 523264   ;;  %vm479_vm12 = vcmask 1043456   ;;  %vm475_vm13 = vcmask 31744  }
  0x22   :  { %262 = vmax.xlane.f32.xlu1 %v261_v14  ;;  %620 = vmatpush3.bf16.msra.mxu0 %v619_v4  ;;  %v628_v14 = vpack.c.bf16 %v398_v13, %v397_v12 }
  0x23   :  { %259 = vmax.xlane.f32.xlu0 %v258_v15  ;;  %621 = vmatprep.subr.bf16.mxu0 %v695_v5 }
  0x26   :  { %100 = vadd.xlane.f32.xlu1 %v99_v20  ;;  %623 = vmatpush3.bf16.msra.mxu0 %v622_v8 }
  0x27   :  { %76 = vadd.xlane.f32.xlu0 %v75_v21  ;;  %624 = vmatprep.subr.bf16.mxu0 %v695_v5 }
  0x2a   :  { %265 = vmax.xlane.f32.xlu1 %v264_v22  ;;  %626 = vmatpush3.bf16.msra.mxu0 %v625_v11 }
  0x2b   :  { %241 = vmax.xlane.f32.xlu0 %v240_v23  ;;  %627 = vmatprep.subr.bf16.mxu0 %v695_v5 }
  0x2e   :  { %103 = vadd.xlane.f32.xlu1 %v102_v28  ;;  %629 = vmatpush3.bf16.msra.mxu0 %v628_v14 }
  0x2f   :  { %79 = vadd.xlane.f32.xlu0 %v78_v29 }
  0x32   :  { %268 = vmax.xlane.f32.xlu1 %v267_v30 }
  0x33   :  { %244 = vmax.xlane.f32.xlu0 %v243_v31 }
  0x36   :  { %106 = vadd.xlane.f32.xlu1 %v105_v36 }
  0x37   :  { %82 = vadd.xlane.f32.xlu0 %v81_v37  ;;  %v139_v37 = vadd.s32 4294967288, %v134_v35 }
  0x3a   :  { %271 = vmax.xlane.f32.xlu1 %v270_v38  ;;  %v136_v38 = vshrl.u32 %v133_v32, 7 }
  0x3b   :  { %247 = vmax.xlane.f32.xlu0 %v246_v39  ;;  %v146_v39 = vadd.s32 4294967280, %v134_v35 }
  0x3c   :  { %v137_v48 = vsub.s32 %v134_v35, %v136_v38  ;;  %v802_v51 = vsub.s32 %v153_v41, %v136_v38 }
  0x3d   :  { %v149_v49 = vsub.s32 %v146_v39, %v136_v38 }
  0x3e   :  { %109 = vadd.xlane.f32.xlu1 %v108_v44  ;;  %v167_v44 = vadd.s32 4294967256, %v134_v35 }
  0x3f   :  { %85 = vadd.xlane.f32.xlu0 %v84_v45  ;;  %v174_v45 = vadd.s32 4294967248, %v134_v35 }
  0x42   :  { %274 = vmax.xlane.f32.xlu1 %v273_v46  ;;  %v142_v46 = vsub.s32 %v139_v37, %v136_v38 }
  0x43   :  { %250 = vmax.xlane.f32.xlu0 %v249_v47  ;;  %v181_v47 = vadd.s32 4294967240, %v134_v35 }
  0x45   :  { %v814_v58 = vsub.s32 %v181_v47, %v136_v38  ;;  %v68_v47 = vld [vmem:[#allocation2] sm:$0x3] }
  0x46   :  { %112 = vadd.xlane.f32.xlu1 %v111_v52  ;;  %v804_v52 = vsub.s32 %v160_v42, %v136_v38 }
  0x47   :  { %88 = vadd.xlane.f32.xlu0 %v87_v53 }
  0x4a   :  { %277 = vmax.xlane.f32.xlu1 %v276_v54  ;;  %v808_v54 = vsub.s32 %v167_v44, %v136_v38 }
  0x4b   :  { %253 = vmax.xlane.f32.xlu0 %v252_v55  ;;  %v810_v55 = vsub.s32 %v174_v45, %v136_v38 }
  0x4e   :  { %115 = vadd.xlane.f32.xlu1 %v114_v60 }
  0x4f   :  { %91 = vadd.xlane.f32.xlu0 %v90_v61 }
  0x52   :  { %280 = vmax.xlane.f32.xlu1 %v279_v62 }
  0x53   :  { %256 = vmax.xlane.f32.xlu0 %v255_v63 }
  0xa3   :  { %v756_v15 = vpop.xlane.xlu1 %94 }
  0xa4   :  { %v758_v16 = vpop.xlane.xlu0 %70  ;;  %v191_v0 = vrot.slane %v756_v15, %v137_v48 }
  0xa5   :  { %v138_v1 = vrot.slane %v758_v16, %v137_v48 }
  0xa7   :  { %v760_v17 = vpop.xlane.xlu1 %97 }
  0xa8   :  { %v762_v18 = vpop.xlane.xlu0 %73  ;;  %v195_v56 = vrot.slane %v760_v17, %v142_v46 }
  0xa9   :  { %v143_v57 = vrot.slane %v762_v18, %v142_v46 }
  0xaa   :  { %v196_v8 = vsel %vm144_vm2, %v195_v56, %v191_v0  ;;  %v233_v0 = vld [vmem:[#allocation3] sm:$0x3] }
  0xab   :  { %v764_v19 = vpop.xlane.xlu1 %238  ;;  %v145_v9 = vsel %vm144_vm2, %v143_v57, %v138_v1 }
  0xac   :  { %v766_v20 = vpop.xlane.xlu0 %235  ;;  %v305_v59 = vrot.slane %v764_v19, %v142_v46 }
  0xad   :  { %v301_v60 = vrot.slane %v766_v20, %v137_v48 }
  0xaf   :  { %v768_v21 = vpop.xlane.xlu1 %262  ;;  %v306_v11 = vsel %vm144_vm2, %v305_v59, %v301_v60 }
  0xb0   :  { %v770_v22 = vpop.xlane.xlu0 %259  ;;  %v344_v61 = vrot.slane %v768_v21, %v142_v46 }
  0xb1   :  { %v340_v62 = vrot.slane %v770_v22, %v137_v48 }
  0xb3   :  { %v772_v23 = vpop.xlane.xlu1 %100  ;;  %v345_v12 = vsel %vm144_vm2, %v344_v61, %v340_v62 }
  0xb4   :  { %v774_v24 = vpop.xlane.xlu0 %76  ;;  %v200_v2 = vrot.slane %v772_v23, %v149_v49 }
  0xb5   :  { %v150_v3 = vrot.slane %v774_v24, %v149_v49 }
  0xb6   :  { %v201_v16 = vsel %vm151_vm3, %v200_v2, %v196_v8  ;;  %v399_v8 = vld [vmem:[%s908_s2] sm:$0xf]  ;;  %s664_s2 = scalar_lea.vmem %s571_s16, 32 }
  0xb7   :  { %v776_v25 = vpop.xlane.xlu1 %265  ;;  %v152_v17 = vsel %vm151_vm3, %v150_v3, %v145_v9  ;;  %614 = vmatpush3.msk.msra.mxu1 %vm479_vm12, %v399_v8  ;;  %p665_p8 = scmp.ne.s32.totalorder %s571_s16, %s664_s2  ;;  %p670_p10 = scmp.lt.s32.totalorder %s664_s2, %s664_s2 }
  0xb8   :  { %v778_v26 = vpop.xlane.xlu0 %241  ;;  %v349_v5 = vrot.slane %v776_v25, %v149_v49 }
  0xb9   :  { %v310_v6 = vrot.slane %v778_v26, %v149_v49  ;;  %p671_p11 = por %p670_p10, %p669_p9 }
  0xba   :  { %v350_v21 = vsel %vm151_vm3, %v349_v5, %v345_v12 }
  0xbb   :  { %v780_v27 = vpop.xlane.xlu1 %103  ;;  %v311_v22 = vsel %vm151_vm3, %v310_v6, %v306_v11  ;;  %p672_p12 = pnand %p671_p11, %p665_p8 }
  0xbc   :  { %v782_v28 = vpop.xlane.xlu0 %79  ;;  %v205_v7 = vrot.slane %v780_v27, %v802_v51 }
  0xbd   :  { %v157_v10 = vrot.slane %v782_v28, %v802_v51 }
  0xbe   :  { %v206_v23 = vsel %vm158_vm4, %v205_v7, %v201_v16 }
  0xbf   :  { %v784_v29 = vpop.xlane.xlu1 %268  ;;  %v159_v25 = vsel %vm158_vm4, %v157_v10, %v152_v17 }
  0xc0   :  { %v786_v30 = vpop.xlane.xlu0 %244  ;;  %v354_v26 = vrot.slane %v784_v29, %v802_v51 }
  0xc1   :  { %v315_v27 = vrot.slane %v786_v30, %v802_v51 }
  0xc3   :  { %v788_v31 = vpop.xlane.xlu1 %106  ;;  %v316_v48 = vsel %vm158_vm4, %v315_v27, %v311_v22 }
  0xc4   :  { %v790_v33 = vpop.xlane.xlu0 %82  ;;  %v210_v13 = vrot.slane %v788_v31, %v804_v52 }
  0xc5   :  { %v164_v14 = vrot.slane %v790_v33, %v804_v52 }
  0xc6   :  { %v211_v31 = vsel %vm165_vm5, %v210_v13, %v206_v23 }
  0xc7   :  { %v792_v34 = vpop.xlane.xlu1 %271  ;;  %v166_v32 = vsel %vm165_vm5, %v164_v14, %v159_v25 }
  0xc8   :  { %v794_v36 = vpop.xlane.xlu0 %247  ;;  %v359_v33 = vrot.slane %v792_v34, %v804_v52 }
  0xc9   :  { %v320_v35 = vrot.slane %v794_v36, %v804_v52 }
  0xcb   :  { %v796_v40 = vpop.xlane.xlu1 %109  ;;  %v321_v52 = vsel %vm165_vm5, %v320_v35, %v316_v48 }
  0xcc   :  { %v798_v43 = vpop.xlane.xlu0 %85  ;;  %v215_v18 = vrot.slane %v796_v40, %v808_v54 }
  0xcd   :  { %v171_v19 = vrot.slane %v798_v43, %v808_v54  ;;  %v355_v43 = vsel %vm158_vm4, %v354_v26, %v350_v21 }
  0xce   :  { %v216_v38 = vsel %vm172_vm6, %v215_v18, %v211_v31  ;;  %v360_v49 = vsel %vm165_vm5, %v359_v33, %v355_v43 }
  0xcf   :  { %v800_v50 = vpop.xlane.xlu1 %274  ;;  %v173_v29 = vsel %vm172_vm6, %v171_v19, %v166_v32 }
  0xd0   :  { %v806_v53 = vpop.xlane.xlu0 %250  ;;  %v364_v30 = vrot.slane %v800_v50, %v808_v54 }
  0xd1   :  { %v325_v41 = vrot.slane %v806_v53, %v808_v54 }
  0xd2   :  { %v365_v53 = vsel %vm172_vm6, %v364_v30, %v360_v49 }
  0xd3   :  { %v113_v63 = vpop.xlane.xlu1 %112 }
  0xd4   :  { %v89_v4 = vpop.xlane.xlu0 %88  ;;  %v220_v24 = vrot.slane %v113_v63, %v810_v55 }
  0xd5   :  { %v178_v28 = vrot.slane %v89_v4, %v810_v55 }
  0xd6   :  { %v221_v42 = vsel %vm179_vm7, %v220_v24, %v216_v38 }
  0xd7   :  { %v278_v15 = vpop.xlane.xlu1 %277  ;;  %v180_v44 = vsel %vm179_vm7, %v178_v28, %v173_v29 }
  0xd8   :  { %v254_v20 = vpop.xlane.xlu0 %253  ;;  %v369_v34 = vrot.slane %v278_v15, %v810_v55 }
  0xd9   :  { %v330_v45 = vrot.slane %v254_v20, %v810_v55  ;;  %v326_v55 = vsel %vm172_vm6, %v325_v41, %v321_v52 }
  0xda   :  { %v370_v59 = vsel %vm179_vm7, %v369_v34, %v365_v53 }
  0xdb   :  { %v116_v37 = vpop.xlane.xlu1 %115  ;;  %v331_v62 = vsel %vm179_vm7, %v330_v45, %v326_v55 }
  0xdc   :  { %v225_v39 = vrot.slane %v116_v37, %v814_v58  ;;  %v92_v40 = vpop.xlane.xlu0 %91 }
  0xdd   :  { %v185_v36 = vrot.slane %v92_v40, %v814_v58 }
  0xde   :  { %v226_v46 = vsel %vm186_vm8, %v225_v39, %v221_v42 }
  0xdf   :  { %v187_v50 = vsel %vm186_vm8, %v185_v36, %v180_v44  ;;  %v281_v51 = vpop.xlane.xlu1 %280 }
  0xe0   :  { %v228_v54 = vsel %vm227_vm9, %v226_v46, %v187_v50  ;;  %v374_v56 = vrot.slane %v281_v51, %v814_v58  ;;  %v257_v57 = vpop.xlane.xlu0 %256 }
  0xe1   :  { %v335_v60 = vrot.slane %v257_v57, %v814_v58  ;;  %v230_v61 = vadd.f32 %v228_v54, %v68_v47 }
  0xe2   :  { %v375_v63 = vsel %vm186_vm8, %v374_v56, %v370_v59 }
  0xe3   :  { %v336_v1 = vsel %vm186_vm8, %v335_v60, %v331_v62  ;;  %232 = vst.msk [vmem:[#allocation2] sm:$0x3] %vm33_vm0, %v230_v61 }
  0xe4   :  { %v376_v2 = vsel %vm227_vm9, %v375_v63, %v336_v1 }
  0xe5   :  { %v378_v3 = vmax.f32 %v233_v0, %v376_v2 }
  0xe7   :  { %379 = vst.msk [vmem:[#allocation3] sm:$0x3] %vm33_vm0, %v378_v3 }
  0xea   :  { %v383_v4 = vld [vmem:[#allocation2] sm:$0x3] }
  0xeb   :  { %v384_v6 = vmul.f32 0.00390625, %v383_v4 }
  0xee   :  { %v385_v5 = vld [vmem:[#allocation3] sm:$0x3] }
  0xef   :  { %v387_v58 = vrot.slane %v385_v5, 6 }
  0xf1   :  { %v390_v7 = vsel %vm389_vm10, %v384_v6, %v387_v58 }
  0xf2   :  { %611 = vmatmul.mubr.msk.f32.vlgmr.msra.gmra.mrb[0].mxu0 %vm400_vm11, %v390_v7 }
 0x1c5   :  { %v470_v9 = vpop.f32.mrb[0].mxu0 }
 0x1c6   :  { %v474_v10 = vmax.f32 %v470_v9, 0.0  ;;  %v612_v11 = vpop.f32.mrb[1].mxu0 }
 0x1c8   :  { %616 = vmatmul.mubr.msk.f32.vlgmr.msra.gmra.mrb[0].mxu1 %vm475_vm13, %v474_v10 }
 0x29b   :  { %v549_v12 = vpop.f32.mrb[0].mxu1 }
 0x29c   :  { %v554_v13 = vrot.slane %v549_v12, 2  ;;  %v617_v14 = vpop.f32.mrb[1].mxu1 }
 0x29e   :  { %v556_v15 = vadd.f32 %v554_v13, %v549_v12 }
 0x2a0   :  { %v582_v16 = vmul.f32 -1.442695, %v556_v15 }
 0x2a2   :  { %638 = vpow2.f32 %v582_v16 }
 0x2ac   :  { %v639_v17 = vpop.eup %638 }
 0x2ad   :  { %v560_v18 = vadd.f32 1.0, %v639_v17 }
 0x2af   :  { %640 = vrcp.f32 %v560_v18 }
 0x2b9   :  { %v641_v19 = vpop.eup %640 }
 0x2ba   :  { %563 = vst.msk [vmem:[#allocation7] sm:$0x3] %vm33_vm0, %v641_v19 }
 0x2bb   :  { %675 = shalt.err (!%p672_p12)
}
 0x2bc   :  { %s676_s19 = scalar_lea.hbm %s909_s3, 32 }
 0x2bd   :  { %p677_p13 = scmp.ne.s32.totalorder %s909_s3, %s676_s19  ;;  %p680_p0 = scmp.lt.u32.totalorder %s676_s19, %s909_s3 }
 0x2bf   :  { %p682_p1 = pnand %p680_p0, %p677_p13 }
 0x2c1   :  { %685 = shalt.err (!%p682_p1)
}
 0x2c2   :  { %573 = dma.vmem_to_hbm [thread:$0]  %s571_s16, 32, %s909_s3, [#allocation6]  }
 0x2c3   :  { %688 = dma.done.wait [#allocation6], 32  }
 0x2c4   :  { %689 = vsyncadd [#allocation6], 4294967264 }
 0x2c5   :  { %577 = vsyncpa [#allocation5], 1 }
 0x2c6   :  { %578 = vsyncpa [#allocation6], 1 }

</bundles_post_ra>
